<compile_context>
chip_gen: v6e
topology: v6e:2x2x1
jax: 0.10.0
libtpu: 0.0.40
codegen_flags: <defaults>
</compile_context>

<pallas_src>
import jax
import jax.numpy as jnp
from jax.experimental import pallas as pl
from jax.experimental.pallas import tpu as pltpu

_LANES = 128


def _ternary_ste_kernel(x_ref, o_ref):
    x = x_ref[...]
    # FATNN forward: clamp to [0, 2] then round to nearest integer level.
    # jnp.round is round-half-to-even, matching torch.round. 0.5 / 1.5 are
    # exactly representable in bf16, so native-dtype rounding is exact.
    o_ref[...] = jnp.round(jnp.clip(x, 0, 2)).astype(o_ref.dtype)


def _pick_row_tile(n_rows: int, target_rows: int):
    """Pick a row tile that exactly divides n_rows (no padding) if possible."""
    if n_rows <= target_rows:
        # Single block spanning the full row extent (full-extent dims are
        # exempt from the sublane-multiple rule). <= ~1 MiB per buffer.
        return n_rows
    if n_rows % 8 != 0:
        return None  # caller pads
    cand = target_rows - (target_rows % 8)
    while cand >= 256:
        if n_rows % cand == 0:
            return cand
        cand -= 8
    return None  # no reasonable exact divisor -> caller pads


def ternary_ste(x: jax.Array, *, target_rows: int = 2048,
                donate_input: bool = False) -> jax.Array:
    """FATNN ternary activation quantization, y = round(clip(x, 0, 2))."""
    orig_shape = x.shape
    dtype = x.dtype
    total = x.size
    if total == 0:
        return x

    # ---- shape into a lane-dense (rows, 128) slab, avoiding copies ----
    if total % _LANES == 0:
        n_rows = total // _LANES
        x2d = x.reshape(n_rows, _LANES)          # free (contiguous reshape)
        elem_pad = 0
    else:
        n_rows = pl.cdiv(total, _LANES)
        elem_pad = n_rows * _LANES - total
        x2d = jnp.pad(x.reshape(-1), (0, elem_pad)).reshape(n_rows, _LANES)

    # ---- choose row tile; pad rows only if no exact-divisor tile exists ----
    row_tile = _pick_row_tile(n_rows, target_rows)
    if row_tile is None:
        row_tile = target_rows
        padded_rows = pl.cdiv(n_rows, row_tile) * row_tile
        x2d = jnp.pad(x2d, ((0, padded_rows - n_rows), (0, 0)))
    else:
        padded_rows = n_rows

    grid = (padded_rows // row_tile,)

    extra = {}
    if donate_input and elem_pad == 0 and padded_rows == n_rows:
        # Optional in-place variant when the caller no longer needs x.
        extra["input_output_aliases"] = {0: 0}

    out2d = pl.pallas_call(
        _ternary_ste_kernel,
        out_shape=jax.ShapeDtypeStruct((padded_rows, _LANES), dtype),
        grid_spec=pl.GridSpec(
            grid=grid,
            in_specs=[pl.BlockSpec((row_tile, _LANES), lambda i: (i, 0))],
            out_specs=pl.BlockSpec((row_tile, _LANES), lambda i: (i, 0)),
        ),
        compiler_params=pltpu.CompilerParams(
            dimension_semantics=("parallel",)),
        **extra,
    )(x2d)

    if elem_pad == 0 and padded_rows == n_rows:
        return out2d.reshape(orig_shape)         # free (contiguous reshape)
    return out2d.reshape(-1)[:total].reshape(orig_shape)


# TODO(synk): backward (STE / EWGS gradient scaling) is training-only and not
# part of the forward pass; not implemented here.


if __name__ == "__main__":
    key = jax.random.PRNGKey(0)

    # NCHW activation tensor, small shape consistent with the module.
    x = jax.random.normal(key, (2, 4, 16, 16), dtype=jnp.float32) * 1.5
    y = jax.block_until_ready(ternary_ste(x))

    y_ref = jnp.round(jnp.clip(x, 0.0, 2.0))
    assert y.shape == x.shape and y.dtype == x.dtype
    assert jnp.array_equal(y, y_ref), "f32 mismatch vs reference"
    assert bool(jnp.all((y == 0) | (y == 1) | (y == 2)))

    # Native bf16 I/O path + multi-step grid (4096 rows -> 2 tiles of 2048).
    xb = (jax.random.normal(jax.random.PRNGKey(1), (2, 16, 128, 128),
                            dtype=jnp.float32) * 1.5).astype(jnp.bfloat16)
    yb = jax.block_until_ready(ternary_ste(xb))
    yb_ref = jnp.round(jnp.clip(xb.astype(jnp.float32), 0.0, 2.0)).astype(jnp.bfloat16)
    assert yb.shape == xb.shape and yb.dtype == jnp.bfloat16
    assert jnp.array_equal(yb, yb_ref), "bf16 mismatch vs reference"

    print("KERNEL_OK")
</pallas_src>

<mosaic_0001>
module attributes {stable_mosaic.version = 11 : i64} {
  func.func @_ternary_ste_kernel(%arg0: i32, %arg1: memref<16x128xf32, #tpu.memory_space<vmem>>, %arg2: memref<16x128xf32, #tpu.memory_space<vmem>>) attributes {dimension_semantics = [#tpu.dimension_semantics<parallel>], iteration_bounds = array<i64: 1>, scalar_prefetch = 0 : i64, scratch_operands = 0 : i64, tpu.core_type = #tpu.core_type<tc>, window_params = [{transform_indices = @transform_0, window_bounds = array<i64: 16, 128>}, {transform_indices = @transform_1, window_bounds = array<i64: 16, 128>}]} {
    %c0 = arith.constant 0 : index
    %c0_0 = arith.constant 0 : index
    %0 = vector.load %arg1[%c0, %c0_0] : memref<16x128xf32, #tpu.memory_space<vmem>>, vector<16x128xf32>
    %c0_i32 = arith.constant 0 : i32
    %c2_i32 = arith.constant 2 : i32
    %1 = arith.sitofp %c0_i32 : i32 to f32
    %2 = vector.broadcast %1 : f32 to vector<16x128xf32>
    %3 = arith.maximumf %2, %0 : vector<16x128xf32>
    %4 = arith.sitofp %c2_i32 : i32 to f32
    %5 = vector.broadcast %4 : f32 to vector<16x128xf32>
    %6 = arith.minimumf %5, %3 : vector<16x128xf32>
    %7 = math.roundeven %6 : vector<16x128xf32>
    %c0_1 = arith.constant 0 : index
    %c0_2 = arith.constant 0 : index
    %8 = vector.load %arg2[%c0_1, %c0_2] : memref<16x128xf32, #tpu.memory_space<vmem>>, vector<16x128xf32>
    tpu.vector_store %arg2[%c0_1, %c0_2], %7 {strides = array<i32>} : memref<16x128xf32, #tpu.memory_space<vmem>>, vector<16x128xf32>,
    return
  }
  func.func @transform_0(%arg0: i32) -> (i32, i32) {
    %c0_i32 = arith.constant 0 : i32
    %c0_i32_0 = arith.constant 0 : i32
    return %arg0, %c0_i32 : i32, i32
  }
  func.func @transform_1(%arg0: i32) -> (i32, i32) {
    %c0_i32 = arith.constant 0 : i32
    %c0_i32_0 = arith.constant 0 : i32
    return %arg0, %c0_i32 : i32, i32
  }
}

</mosaic_0001>

<bundles_post_ra>
// kernel: tpu_custom_call.1
= control target key start
LH: loop header
LB: loop body
LE: loop exit
PB: predicated region body
PF: predicated region fallthrough
CT: control target
= control target key end

     0   :  { %6 = vsyncpa [#allocation3], 0  ;;  %s140_s0 = inlined_call_operand.hbm [shape: f32[16,128], index: 0, kind: input, shape index: {}]   ;;  %s141_s1 = inlined_call_operand.hbm [shape: f32[16,128], index: 1, kind: output, shape index: {}]  }
   0x1   :  { %7 = vsyncpa [#allocation4], 0  ;;  %s114_s6 = smov [#allocation2]  }
   0x2   :  { %s13_s7 = sshll.u32 %s114_s6, 4  ;;  %s14_s7 = int_to_ptr.vmem [resolvable:$true] %s13_s7 }
   0x3   :  { %s78_s8 = scalar_lea.vmem %s14_s7, 256  ;;  %p83_p1 = scmp.lt.s32.totalorder %s14_s7, %s14_s7 }
   0x4   :  { %p79_p0 = scmp.ne.s32.totalorder %s14_s7, %s78_s8  ;;  %p84_p2 = scmp.lt.s32.totalorder %s78_s8, %s78_s8 }
   0x6   :  { %p85_p3 = por %p84_p2, %p83_p1 }
   0x8   :  { %p86_p4 = pnand %p85_p3, %p79_p0 }
   0xa   :  { %89 = shalt.err (!%p86_p4)
}
   0xb   :  { %s115_s9 = smov 128   ;;  %s116_s10 = smov 8  }
   0xc   :  { %19 = dma.hbm_to_vmem [thread:$0]  %s140_s0, 256, %s14_s7, [#allocation3], %s115_s9, %s115_s9, %s116_s10  }
   0xd   :  { %110 = dma.done.wait [#allocation3], 256  }
   0xe   :  { %111 = vsyncadd [#allocation3], 4294967040  ;;  %v23_v0 = vld [vmem:[#allocation2] sm:$0xff]  ;;  %v24_v1 = vld [vmem:[#allocation2 + $0x8] sm:$0xff]  ;;  %s117_s0 = smov [#allocation5]  }
   0xf   :  { %v25_v2 = vmax.f32 %v23_v0, 0.0  ;;  %v26_v3 = vmax.f32 %v24_v1, 0.0  ;;  %s38_s13 = sshll.u32 %s117_s0, 4  ;;  %s39_s13 = int_to_ptr.vmem [resolvable:$true] %s38_s13 }
  0x10   :  { %s90_s14 = scalar_lea.vmem %s39_s13, 256  ;;  %p95_p6 = scmp.lt.s32.totalorder %s39_s13, %s39_s13 }
  0x11   :  { %v27_v4 = vmin.f32 %v25_v2, 2.0  ;;  %v28_v5 = vmin.f32 %v26_v3, 2.0  ;;  %p91_p5 = scmp.ne.s32.totalorder %s39_s13, %s90_s14  ;;  %p96_p7 = scmp.lt.s32.totalorder %s90_s14, %s90_s14 }
  0x13   :  { %v52_v6 = vcvt.f32.s32 %v27_v4  ;;  %v50_v7 = vand.u32 2147483647, %v27_v4  ;;  %v60_v8 = vcvt.f32.s32 %v28_v5  ;;  %v55_v10 = vand.u32 2147483648, %v27_v4  ;;  %p97_p8 = por %p96_p7, %p95_p6 }
  0x14   :  { %v58_v11 = vand.u32 2147483647, %v28_v5  ;;  %v63_v13 = vand.u32 2147483648, %v28_v5 }
  0x15   :  { %v53_v9 = vcvt.s32.f32 %v52_v6  ;;  %v61_v12 = vcvt.s32.f32 %v60_v8  ;;  %vm51_vm0 = vcmp.lt.f32.partialorder %v50_v7, 8388608.0  ;;  %p98_p9 = pnand %p97_p8, %p91_p5 }
  0x16   :  { %vm59_vm1 = vcmp.lt.f32.partialorder %v58_v11, 8388608.0 }
  0x17   :  { %v54_v14 = vand.u32 2147483647, %v53_v9  ;;  %v62_v15 = vand.u32 2147483647, %v61_v12 }
  0x19   :  { %v56_v16 = vor.u32 %v55_v10, %v54_v14  ;;  %v64_v17 = vor.u32 %v63_v13, %v62_v15 }
  0x1b   :  { %v57_v18 = vsel %vm51_vm0, %v56_v16, %v27_v4  ;;  %v65_v19 = vsel %vm59_vm1, %v64_v17, %v28_v5 }
  0x1c   :  { %31 = vst [vmem:[#allocation5] sm:$0xff] %v57_v18  ;;  %32 = vst [vmem:[#allocation5 + $0x8] sm:$0xff] %v65_v19 }
  0x1d   :  { %101 = shalt.err (!%p98_p9)
}
  0x1e   :  { %44 = dma.vmem_to_hbm [thread:$0]  %s39_s13, 256, %s141_s1, [#allocation4], %s115_s9, %s115_s9, %s116_s10  }
  0x1f   :  { %112 = dma.done.wait [#allocation4], 256  }
  0x20   :  { %113 = vsyncadd [#allocation4], 4294967040 }
  0x21   :  { %48 = vsyncpa [#allocation3], 1 }
  0x22   :  { %49 = vsyncpa [#allocation4], 1 }

</bundles_post_ra>
